<compile_context>
chip_gen: v6e
topology: v6e:2x2x1
jax: 0.10.0
libtpu: 0.0.40
codegen_flags: <defaults>
</compile_context>

<pallas_src>
import functools

import jax
import jax.numpy as jnp
from jax.experimental import pallas as pl
from jax.experimental.pallas import tpu as pltpu


def _round_up(x, m):
    return (x + m - 1) // m * m


def _device_kind():
    try:
        return jax.devices()[0].device_kind.lower()
    except Exception:
        return ""


def _vmem_capacity_bytes():
    """Per-TensorCore VMEM capacity, generation-aware, with safe fallbacks."""
    try:
        cap = getattr(pltpu.get_tpu_info(), "vmem_capacity_bytes", None)
        if cap:
            return int(cap)
    except Exception:
        pass
    kind = _device_kind()
    if "v7" in kind:
        return 64 * 1024 * 1024       # v7x: 64 MiB / TC
    return 128 * 1024 * 1024          # v5e / v6e: 128 MiB


def _has_bf16_vpu():
    # v6e / v7x have bf16 VPU+EUP; v2-v5 do not.
    kind = _device_kind()
    return kind != "" and not any(t in kind for t in ("v2", "v3", "v4", "v5"))


def _bilinear_attn_kernel(q_ref, wt_ref, k_ref, v_ref, bias_ref, *out_refs,
                          compute_dtype, exp_dtype, write_attn):
    # q_ref:    (BT, TL1, Dq)   compute_dtype
    # wt_ref:   (Dq, Dk)        compute_dtype   (W^T, pre-transposed in wrapper)
    # k_ref:    (BT, L2p, Dk)   compute_dtype   (Dk unpadded -> no zero-lane K/V traffic)
    # v_ref:    (BT, L2p, Dk)   compute_dtype
    # bias_ref: (BT, 1, L2p)    float32         (0 = keep, -1e30 = masked/padded)
    # out_refs: out (BT, TL1, Dk) f32  [, attn (BT, TL1, L2p) compute_dtype]
    out_ref = out_refs[0]
    attn_ref = out_refs[1] if write_attn else None

    bt, tl1, dq = q_ref.shape
    dk = wt_ref.shape[1]
    cdt = compute_dtype

    # --- projection: W is batch-shared, so collapse (bt, tl1) rows into one MXU pass ---
    q2 = q_ref[...].reshape(bt * tl1, dq)                        # tl1 % 8 == 0 -> cheap
    q_proj = jnp.dot(q2, wt_ref[...], preferred_element_type=jnp.float32)
    q_proj = q_proj.astype(cdt).reshape(bt, tl1, dk)

    # --- scores = q_proj @ k^T : batched NT dot_general (no transpose materialized) ---
    scores = jax.lax.dot_general(
        q_proj, k_ref[...],
        dimension_numbers=(((2,), (2,)), ((0,), (0,))),
        preferred_element_type=jnp.float32,
    )                                                            # (bt, tl1, l2p) f32

    # --- masked softmax over L2 (additive bias; exp optionally bf16 on bf16-VPU parts) ---
    masked = scores + bias_ref[...].astype(jnp.float32)          # broadcast (bt,1,l2p)
    m = jnp.max(masked, axis=-1, keepdims=True)
    e = jnp.exp((masked - m).astype(exp_dtype)).astype(jnp.float32)
    denom = jnp.sum(e, axis=-1, keepdims=True)
    attn = e * pl.reciprocal(denom, approx=False)                # exact: rows sum to 1

    # --- out = attn @ v : batched NN dot_general ---
    out = jax.lax.dot_general(
        attn.astype(cdt), v_ref[...],
        dimension_numbers=(((2,), (1,)), ((0,), (0,))),
        preferred_element_type=jnp.float32,
    )                                                            # (bt, tl1, dk) f32

    out_ref[...] = out.astype(out_ref.dtype)
    if write_attn:
        attn_ref[...] = attn.astype(attn_ref.dtype)


def bilinear_attention(q, w, k, v=None, rep_mask=None, *,
                       compute_dtype=None, return_attn=True, fast_exp=None):
    """Pallas TPU forward of BilinearAttention.

    q: (B, L1, q_dim); w: (k_dim, q_dim); k: (B, L2, k_dim); v: (B, L2, k_dim) or None;
    rep_mask: (B, L2) or None. Returns (out, attn) — attn is None if return_attn=False.
    """
    if v is None:
        v = k
    B, L1, q_dim = q.shape
    _, L2, k_dim = k.shape
    assert w.shape == (k_dim, q_dim)
    if compute_dtype is None:
        compute_dtype = q.dtype
    compute_dtype = jnp.dtype(compute_dtype)
    if fast_exp is None:
        # bf16 exp only when the caller already opted into reduced precision and HW supports it
        # (keeps the default f32 path numerically faithful to the PyTorch module).
        fast_exp = (compute_dtype == jnp.bfloat16) and _has_bf16_vpu()
    exp_dtype = jnp.bfloat16 if fast_exp else jnp.float32

    # ---- generation-aware VMEM policy ----
    vmem_cap = _vmem_capacity_bytes()
    vmem_limit = min(vmem_cap * 3 // 4, 96 * 1024 * 1024)   # ~48 MiB v7x, 96 MiB v5e/v6e
    vmem_budget = int(vmem_limit * 0.8)
    row_cap = 512 if vmem_cap >= 96 * 1024 * 1024 else 256

    # ---- tile sizing: lane-dense attn, fold batches when L1 tiles are small ----
    L2p = _round_up(L2, 128)                     # softmax axis / attn last dim (lane-dense)
    TILE_L1 = min(_round_up(L1, 8), row_cap)
    B_TILE = max(1, min(B, row_cap // TILE_L1))
    # Guarantee >= 2 batch grid tiles (when B >= 2) so megacore splits on batch and the two
    # TensorCores stream disjoint K/V instead of duplicating HBM reads.
    while B_TILE > 1 and pl.cdiv(B, B_TILE) < 2:
        B_TILE //= 2

    in_bpe = compute_dtype.itemsize
    attn_bpe = in_bpe

    def _est(bt, tl1):
        io = (bt * tl1 * q_dim * in_bpe                 # q
              + q_dim * k_dim * in_bpe                  # W^T
              + 2 * bt * L2p * k_dim * in_bpe           # k, v (unpadded k_dim)
              + bt * L2p * 4                            # bias
              + bt * tl1 * k_dim * 4                    # out
              + (bt * tl1 * L2p * attn_bpe if return_attn else 0))
        # live f32 softmax intermediates (scores, e, attn) + q_proj, previously uncounted
        interm = 3 * bt * tl1 * L2p * 4 + bt * tl1 * k_dim * 4
        return 2 * io + interm                          # double-buffered I/O + intermediates

    while B_TILE > 1 and _est(B_TILE, TILE_L1) > vmem_budget:
        B_TILE //= 2
    while TILE_L1 > 8 and _est(B_TILE, TILE_L1) > vmem_budget:
        TILE_L1 = max(8, TILE_L1 // 2)
    # TODO(synk): very long L2 still needs flash-style online-softmax tiling over L2 (third,
    #             innermost "arbitrary" grid axis with m/l/acc VMEM scratch); here K/V blocks
    #             span the full L2p and only B_TILE/TILE_L1 shrink under VMEM pressure.

    L1p = _round_up(L1, TILE_L1)
    Bp = _round_up(B, B_TILE)

    # ---- pad + pre-transform inputs once in the wrapper (no k_dim padding) ----
    q_p = jnp.pad(q, ((0, Bp - B), (0, L1p - L1), (0, 0))).astype(compute_dtype)
    k_p = jnp.pad(k, ((0, Bp - B), (0, L2p - L2), (0, 0))).astype(compute_dtype)
    v_p = jnp.pad(v, ((0, Bp - B), (0, L2p - L2), (0, 0))).astype(compute_dtype)
    wt_p = jnp.asarray(w).T.astype(compute_dtype)                 # (q_dim, k_dim)

    if rep_mask is None:
        bias = jnp.zeros((B, L2), jnp.float32)
    else:
        bias = jnp.where(rep_mask > 0, 0.0, -1e30).astype(jnp.float32)
    bias = jnp.pad(bias, ((0, Bp - B), (0, L2p - L2)), constant_values=-1e30)
    bias = bias[:, None, :]                                       # (Bp, 1, L2p)

    grid = (Bp // B_TILE, L1p // TILE_L1)
    kernel = functools.partial(_bilinear_attn_kernel, compute_dtype=compute_dtype,
                               exp_dtype=exp_dtype, write_attn=return_attn)

    out_shapes = [jax.ShapeDtypeStruct((Bp, L1p, k_dim), jnp.float32)]
    out_specs = [pl.BlockSpec((B_TILE, TILE_L1, k_dim), lambda b, i: (b, i, 0))]
    if return_attn:
        out_shapes.append(jax.ShapeDtypeStruct((Bp, L1p, L2p), compute_dtype))
        out_specs.append(pl.BlockSpec((B_TILE, TILE_L1, L2p), lambda b, i: (b, i, 0)))

    # Advisory cost estimate so XLA schedules the surrounding pads / transposes / slices well.
    flops = (2 * Bp * L1p * q_dim * k_dim        # projection
             + 2 * Bp * L1p * L2p * k_dim        # scores
             + 2 * Bp * L1p * L2p * k_dim)       # attn @ v
    bytes_accessed = (q_p.size * in_bpe + wt_p.size * in_bpe
                      + k_p.size * in_bpe + v_p.size * in_bpe + bias.size * 4
                      + Bp * L1p * k_dim * 4
                      + (Bp * L1p * L2p * attn_bpe if return_attn else 0))
    cost = pl.CostEstimate(flops=int(flops),
                           transcendentals=int(Bp * L1p * L2p),
                           bytes_accessed=int(bytes_accessed))

    # NOTE: W^T is block-index-invariant; single-buffering it (pl.Buffered(1)) would save only
    # ~q_dim*k_dim*in_bpe bytes here, so it is intentionally left at the default buffering.
    results = pl.pallas_call(
        kernel,
        out_shape=tuple(out_shapes),
        grid_spec=pltpu.PrefetchScalarGridSpec(
            num_scalar_prefetch=0,
            grid=grid,
            in_specs=[
                pl.BlockSpec((B_TILE, TILE_L1, q_dim), lambda b, i: (b, i, 0)),   # q
                pl.BlockSpec((q_dim, k_dim), lambda b, i: (0, 0)),                # W^T (shared)
                pl.BlockSpec((B_TILE, L2p, k_dim), lambda b, i: (b, 0, 0)),       # k
                pl.BlockSpec((B_TILE, L2p, k_dim), lambda b, i: (b, 0, 0)),       # v
                pl.BlockSpec((B_TILE, 1, L2p), lambda b, i: (b, 0, 0)),           # mask bias
            ],
            out_specs=tuple(out_specs),
        ),
        compiler_params=pltpu.CompilerParams(
            dimension_semantics=("parallel", "parallel"),
            vmem_limit_bytes=int(vmem_limit),
        ),
        cost_estimate=cost,
    )(q_p, wt_p, k_p, v_p, bias)

    out = results[0][:B, :L1, :]
    if not return_attn:
        return out, None
    attn = results[1][:B, :L1, :L2]
    return out, attn


def _reference(q, w, k, v, rep_mask, compute_dtype=jnp.float32):
    """Pure-JAX reference with matched matmul input precision (f32 accumulation)."""
    cdt = compute_dtype
    wt = jnp.asarray(w).T.astype(cdt)
    q_proj = jnp.einsum("bld,dk->blk", q.astype(cdt), wt,
                        preferred_element_type=jnp.float32)
    scores = jnp.einsum("blk,bmk->blm", q_proj.astype(cdt), k.astype(cdt),
                        preferred_element_type=jnp.float32)
    bias = jnp.where(rep_mask > 0, 0.0, -1e30)[:, None, :]
    attn = jax.nn.softmax(scores + bias, axis=-1)
    out = jnp.einsum("blm,bmk->blk", attn.astype(cdt), v.astype(cdt),
                     preferred_element_type=jnp.float32)
    return out, attn


if __name__ == "__main__":
    # Small shapes consistent with the module (lstm_hidden_units -> q_dim = k_dim = 32)
    B, L1, L2, q_dim, k_dim = 2, 8, 8, 32, 32

    key = jax.random.PRNGKey(0)
    kq, kk, kv, kw, km = jax.random.split(key, 5)

    q = jax.random.normal(kq, (B, L1, q_dim), dtype=jnp.float32)
    k = jax.random.normal(kk, (B, L2, k_dim), dtype=jnp.float32)
    v = jax.random.normal(kv, (B, L2, k_dim), dtype=jnp.float32)
    w = jax.random.normal(kw, (k_dim, q_dim), dtype=jnp.float32) * (1.0 / jnp.sqrt(q_dim))
    rep_mask = (jax.random.uniform(km, (B, L2)) > 0.3).astype(jnp.float32)
    rep_mask = rep_mask.at[:, 0].set(1.0)   # at least one valid position per row
    # TODO(synk): rows that are entirely masked produce a uniform attention row (not NaN);
    #             confirm against the project's masked_softmax convention if that case occurs.

    # --- f32 path (matches the PyTorch module's numerics) ---
    out, attn = bilinear_attention(q, w, k, v, rep_mask)
    jax.block_until_ready((out, attn))
    out_ref, attn_ref = _reference(q, w, k, v, rep_mask, jnp.float32)
    assert out.shape == (B, L1, k_dim) and attn.shape == (B, L1, L2)
    assert jnp.allclose(out, out_ref, atol=1e-2, rtol=1e-2)
    assert jnp.allclose(attn, attn_ref, atol=1e-2, rtol=1e-2)
    # structural checks: rows sum to ~1, masked positions are ~0
    assert jnp.allclose(jnp.sum(attn, axis=-1), 1.0, atol=1e-3)
    assert jnp.all(jnp.where(rep_mask[:, None, :] > 0, 0.0, attn) < 1e-6)

    # --- out-only path (skips the attn HBM writeback entirely) ---
    out_only, attn_none = bilinear_attention(q, w, k, v, rep_mask, return_attn=False)
    jax.block_until_ready(out_only)
    assert attn_none is None
    assert jnp.allclose(out_only, out_ref, atol=1e-2, rtol=1e-2)

    # --- bf16 MXU path (f32 accumulation; bf16 exp on bf16-VPU parts) vs matched reference ---
    out16, attn16 = bilinear_attention(q, w, k, v, rep_mask, compute_dtype=jnp.bfloat16)
    jax.block_until_ready((out16, attn16))
    out_ref16, attn_ref16 = _reference(q, w, k, v, rep_mask, jnp.bfloat16)
    assert jnp.allclose(out16, out_ref16, atol=5e-2, rtol=5e-2)
    assert jnp.allclose(attn16.astype(jnp.float32), attn_ref16, atol=5e-2, rtol=5e-2)

    print("KERNEL_OK")
</pallas_src>

<mosaic_0001>
module attributes {stable_mosaic.version = 11 : i64} {
  func.func @_bilinear_attn_kernel(%arg0: i32, %arg1: i32, %arg2: memref<1x8x32xf32, #tpu.memory_space<vmem>>, %arg3: memref<32x32xf32, #tpu.memory_space<vmem>>, %arg4: memref<1x128x32xf32, #tpu.memory_space<vmem>>, %arg5: memref<1x128x32xf32, #tpu.memory_space<vmem>>, %arg6: memref<1x1x128xf32, #tpu.memory_space<vmem>>, %arg7: memref<1x8x32xf32, #tpu.memory_space<vmem>>, %arg8: memref<1x8x128xf32, #tpu.memory_space<vmem>>) attributes {dimension_semantics = [#tpu.dimension_semantics<parallel>, #tpu.dimension_semantics<parallel>], iteration_bounds = array<i64: 2, 1>, scalar_prefetch = 0 : i64, scratch_operands = 0 : i64, tpu.core_type = #tpu.core_type<tc>, window_params = [{transform_indices = @transform_0, window_bounds = array<i64: 1, 8, 32>}, {pipeline_mode = #tpu.pipeline_mode<synchronous>, transform_indices = @transform_1, window_bounds = array<i64: 32, 32>}, {transform_indices = @transform_2, window_bounds = array<i64: 1, 128, 32>}, {transform_indices = @transform_3, window_bounds = array<i64: 1, 128, 32>}, {transform_indices = @transform_4, window_bounds = array<i64: 1, 1, 128>}, {transform_indices = @transform_5, window_bounds = array<i64: 1, 8, 32>}, {transform_indices = @transform_6, window_bounds = array<i64: 1, 8, 128>}]} {
    %c0 = arith.constant 0 : index
    %c0_0 = arith.constant 0 : index
    %c0_1 = arith.constant 0 : index
    %0 = vector.load %arg2[%c0, %c0_0, %c0_1] : memref<1x8x32xf32, #tpu.memory_space<vmem>>, vector<1x8x32xf32>
    %1 = vector.shape_cast %0 : vector<1x8x32xf32> to vector<8x32xf32>
    %c0_2 = arith.constant 0 : index
    %c0_3 = arith.constant 0 : index
    %2 = vector.load %arg3[%c0_2, %c0_3] : memref<32x32xf32, #tpu.memory_space<vmem>>, vector<32x32xf32>
    %cst = arith.constant dense<0.000000e+00> : vector<8x32xf32>
    %3 = tpu.matmul %1, %2, %cst {dimension_numbers = #tpu.dot_dimension_numbers<[1], [0], [0], [1], [0, 0, 1, 1], [], []>} : vector<8x32xf32>, vector<32x32xf32>, vector<8x32xf32> -> vector<8x32xf32>
    %4 = vector.shape_cast %3 : vector<8x32xf32> to vector<1x8x32xf32>
    %c0_4 = arith.constant 0 : index
    %c0_5 = arith.constant 0 : index
    %c0_6 = arith.constant 0 : index
    %5 = vector.load %arg4[%c0_4, %c0_5, %c0_6] : memref<1x128x32xf32, #tpu.memory_space<vmem>>, vector<1x128x32xf32>
    %cst_7 = arith.constant dense<0.000000e+00> : vector<1x8x128xf32>
    %6 = tpu.matmul %4, %5, %cst_7 {dimension_numbers = #tpu.dot_dimension_numbers<[2], [2], [1], [1], [0, 0, 0, 1, 1, 1], [0], [0]>} : vector<1x8x32xf32>, vector<1x128x32xf32>, vector<1x8x128xf32> -> vector<1x8x128xf32>
    %c0_8 = arith.constant 0 : index
    %c0_9 = arith.constant 0 : index
    %c0_10 = arith.constant 0 : index
    %7 = vector.load %arg6[%c0_8, %c0_9, %c0_10] : memref<1x1x128xf32, #tpu.memory_space<vmem>>, vector<1x1x128xf32>
    %8 = vector.broadcast %7 : vector<1x1x128xf32> to vector<1x8x128xf32>
    %9 = arith.addf %6, %8 : vector<1x8x128xf32>
    %cst_11 = arith.constant dense<0xFF800000> : vector<1x8xf32>
    %10 = vector.multi_reduction <maximumf>, %9, %cst_11 [2] : vector<1x8x128xf32> to vector<1x8xf32>
    %11 = vector.shape_cast %10 : vector<1x8xf32> to vector<1x8x1xf32>
    %12 = vector.broadcast %11 : vector<1x8x1xf32> to vector<1x8x128xf32>
    %13 = arith.subf %9, %12 : vector<1x8x128xf32>
    %14 = math.exp %13 : vector<1x8x128xf32>
    %cst_12 = arith.constant dense<0.000000e+00> : vector<1x8xf32>
    %15 = vector.multi_reduction <add>, %14, %cst_12 [2] : vector<1x8x128xf32> to vector<1x8xf32>
    %16 = vector.shape_cast %15 : vector<1x8xf32> to vector<1x8x1xf32>
    %17 = tpu.reciprocal %16 : vector<1x8x1xf32> -> vector<1x8x1xf32>
    %18 = vector.broadcast %17 : vector<1x8x1xf32> to vector<1x8x128xf32>
    %19 = arith.mulf %14, %18 : vector<1x8x128xf32>
    %c0_13 = arith.constant 0 : index
    %c0_14 = arith.constant 0 : index
    %c0_15 = arith.constant 0 : index
    %20 = vector.load %arg5[%c0_13, %c0_14, %c0_15] : memref<1x128x32xf32, #tpu.memory_space<vmem>>, vector<1x128x32xf32>
    %cst_16 = arith.constant dense<0.000000e+00> : vector<1x8x32xf32>
    %21 = tpu.matmul %19, %20, %cst_16 {dimension_numbers = #tpu.dot_dimension_numbers<[2], [1], [1], [2], [0, 0, 0, 1, 1, 2], [0], [0]>} : vector<1x8x128xf32>, vector<1x128x32xf32>, vector<1x8x32xf32> -> vector<1x8x32xf32>
    %c0_17 = arith.constant 0 : index
    %c0_18 = arith.constant 0 : index
    %c0_19 = arith.constant 0 : index
    %22 = vector.load %arg7[%c0_17, %c0_18, %c0_19] : memref<1x8x32xf32, #tpu.memory_space<vmem>>, vector<1x8x32xf32>
    tpu.vector_store %arg7[%c0_17, %c0_18, %c0_19], %21 {strides = array<i32>} : memref<1x8x32xf32, #tpu.memory_space<vmem>>, vector<1x8x32xf32>,
    %c0_20 = arith.constant 0 : index
    %c0_21 = arith.constant 0 : index
    %c0_22 = arith.constant 0 : index
    %23 = vector.load %arg8[%c0_20, %c0_21, %c0_22] : memref<1x8x128xf32, #tpu.memory_space<vmem>>, vector<1x8x128xf32>
    tpu.vector_store %arg8[%c0_20, %c0_21, %c0_22], %19 {strides = array<i32>} : memref<1x8x128xf32, #tpu.memory_space<vmem>>, vector<1x8x128xf32>,
    return
  }
  func.func @transform_0(%arg0: i32, %arg1: i32) -> (i32, i32, i32) {
    %c0_i32 = arith.constant 0 : i32
    %c0_i32_0 = arith.constant 0 : i32
    return %arg0, %arg1, %c0_i32 : i32, i32, i32
  }
  func.func @transform_1(%arg0: i32, %arg1: i32) -> (i32, i32) {
    %c0_i32 = arith.constant 0 : i32
    %c0_i32_0 = arith.constant 0 : i32
    %c0_i32_1 = arith.constant 0 : i32
    return %c0_i32, %c0_i32_0 : i32, i32
  }
  func.func @transform_2(%arg0: i32, %arg1: i32) -> (i32, i32, i32) {
    %c0_i32 = arith.constant 0 : i32
    %c0_i32_0 = arith.constant 0 : i32
    %c0_i32_1 = arith.constant 0 : i32
    return %arg0, %c0_i32, %c0_i32_0 : i32, i32, i32
  }
  func.func @transform_3(%arg0: i32, %arg1: i32) -> (i32, i32, i32) {
    %c0_i32 = arith.constant 0 : i32
    %c0_i32_0 = arith.constant 0 : i32
    %c0_i32_1 = arith.constant 0 : i32
    return %arg0, %c0_i32, %c0_i32_0 : i32, i32, i32
  }
  func.func @transform_4(%arg0: i32, %arg1: i32) -> (i32, i32, i32) {
    %c0_i32 = arith.constant 0 : i32
    %c0_i32_0 = arith.constant 0 : i32
    %c0_i32_1 = arith.constant 0 : i32
    return %arg0, %c0_i32, %c0_i32_0 : i32, i32, i32
  }
  func.func @transform_5(%arg0: i32, %arg1: i32) -> (i32, i32, i32) {
    %c0_i32 = arith.constant 0 : i32
    %c0_i32_0 = arith.constant 0 : i32
    return %arg0, %arg1, %c0_i32 : i32, i32, i32
  }
  func.func @transform_6(%arg0: i32, %arg1: i32) -> (i32, i32, i32) {
    %c0_i32 = arith.constant 0 : i32
    %c0_i32_0 = arith.constant 0 : i32
    return %arg0, %arg1, %c0_i32 : i32, i32, i32
  }
}

</mosaic_0001>

<bundles_post_ra>
// kernel: tpu_custom_call.1
= control target key start
LH: loop header
LB: loop body
LE: loop exit
PB: predicated region body
PF: predicated region fallthrough
CT: control target
= control target key end

     0   :  { %12 = vsyncpa [#allocation3], 0  ;;  %s1468_s0 = inlined_call_operand.vmem [shape: f32[2,8,32], index: 0, kind: input, shape index: {}]   ;;  %s1469_s1 = inlined_call_operand.vmem [shape: f32[32,32], index: 1, kind: input, shape index: {}]   ;;  %s1470_s2 = inlined_call_operand.vmem [shape: f32[2,128,32], index: 2, kind: input, shape index: {}]   ;;  %s1471_s3 = inlined_call_operand.vmem [shape: f32[2,128,32], index: 3, kind: input, shape index: {}]   ;;  %s1472_s4 = inlined_call_operand.vmem [shape: f32[2,1,128], index: 4, kind: input, shape index: {}]   ;;  %s1473_s5 = inlined_call_operand.hbm [shape: f32[2,8,32], index: 5, kind: output, shape index: {0}]   ;;  %s1474_s6 = inlined_call_operand.hbm [shape: f32[2,8,128], index: 6, kind: output, shape index: {1}]  }
   0x1   :  { %14 = vsyncpa [#allocation3 + $0x1], 0 }
   0x2   :  { %15 = vsyncpa [#allocation5], 0 }
   0x3   :  { %17 = vsyncpa [#allocation5 + $0x1], 0  ;;  %s1202_s21 = smov 0   ;;  %s1204_s22 = smov 0  }
   0x4   :  { %s1206_s23 = smov 0   ;;  %s1208_s24 = smov 0  }
   0x5   :  { %s1210_s25 = smov 0   ;;  %s1212_s26 = smov 0  }
   0x6 LB: > { %s830_s27 = sadd.s32 4294967295, %s1161_s26   ;;  %s831_s28 = sadd.s32 4294967294, %s1161_s26   ;;  %s1161_s26 = sphi %s1212_s26, %s23_s26   ;;  %s1157_s25 = sphi %s1210_s25, %s1485_s25   ;;  %s1153_s24 = sphi %s1208_s24, %s1484_s24   ;;  %s1149_s23 = sphi %s1206_s23, %s1483_s23   ;;  %s1145_s22 = sphi %s1204_s22, %s1482_s22   ;;  %s1141_s21 = sphi %s1202_s21, %s1481_s21  }
   0x7   : > { %s35_s29 = sadd.s32 1, %s1157_s25  ;;  %s171_s30 = sadd.s32 1, %s1149_s23 }
   0x8   : > { %p37_p0 = scmp.ge.s32.totalorder %s35_s29, 2  ;;  %p181_p1 = scmp.ne.s32.totalorder %s1149_s23, %s1145_s22 }
   0x9   : > { %p182_p2 = scmp.eq.s32.totalorder %s830_s27, 1  ;;  %p187_p3 = scmp.ne.s32.totalorder %s1145_s22, %s1141_s21 }
   0xa   : > { %s1487_s29 = smov (%p37_p0, %s35_s29), 0  ;;  %p188_p5 = scmp.eq.s32.totalorder %s831_s28, 1 }
   0xb   : > { %p1242_p4 = por %p182_p2, %p181_p1  ;;  %s166_s8 = ssub.s32 %s1157_s25, %s1487_s29 }
   0xc   : > { %p834_p6 = scmp.ge.s32.totalorder %s1161_s26, 1  ;;  %p169_p7 = scmp.eq.s32.totalorder %s166_s8, 0 }
   0xd   : > { %p1249_p8 = por %p188_p5, %p187_p3  ;;  %p269_p9 = scmp.lt.s32.totalorder %s1161_s26, 3 }
   0xe   : > { %s1255_s10 = scalar_select %p169_p7, %s1149_s23, %s171_s30  }
   0xf   : > { %p270_p10 = pnand %p834_p6, %p269_p9 }
  0x10   : > { %p319_p11 = scmp.lt.s32.totalorder (!%p270_p10), %s1153_s24, 1  ;;  %s1475_s30 = sshll.u32 (!%p270_p10), %s1153_s24, 7 }
  0x11   : > { %273 = sbr.rel (%p270_p10) target bundleno = 936 (0x3a8), region = 40  ;;  %s691_s12 = scalar_lea.hbm (!%p270_p10), %s1474_s6, %s1475_s30 }
  0x16   : > { %v343_v0 = vld [vmem:[%s1469_s1 + $0x18] sm:$0xff]  ;;  %v1163_v1 = vmov 0.0   ;;  %v342_v2 = vld [vmem:[%s1469_s1 + $0x10] sm:$0xff]  ;;  %vm1164_vm0 = vmmov 0   ;;  %s1268_s15 = scalar_select %p319_p11, %s1153_s24, 1  ;;  %v341_v3 = vld [vmem:[%s1469_s1 + $0x8] sm:$0xff] }
  0x17   : > { %908 = vmatprep.subr.mxu0 %v1163_v1  ;;  %916 = vmatprep.mubr.msk.f32.mxu0 %vm1164_vm0, %v1163_v1  ;;  %v340_v4 = vld [vmem:[%s1469_s1] sm:$0xff]  ;;  %vm344_vm1 = vcmask 261120  }
  0x18   : > { %909 = vmatpush3.msra.mxu0 %v343_v0  ;;  %919 = vmatprep.subr.mxu1 %v1163_v1  ;;  %s837_s18 = sshll.u32 %s1268_s15, 3  ;;  %s867_s19 = sshll.u32 %s1268_s15, 7 }
  0x19   : > { %910 = vmatprep.subr.mxu0 %v1163_v1  ;;  %951 = vmatprep.mubr.msk.f32.mxu1 %vm1164_vm0, %v1163_v1  ;;  %s325_s8 = scalar_lea.vmem %s1468_s0, %s837_s18  ;;  %s1291_s13 = scalar_lea.vmem %s1470_s2, %s867_s19 }
  0x1a   : > { %911 = vmatpush3.msra.mxu0 %v342_v2  ;;  %v339_v5 = vld [vmem:[%s325_s8] sm:$0xff]  ;;  %v433_v6 = vld [vmem:[%s1291_s13 + $0x78] sm:$0xff]  ;;  %v432_v7 = vld [vmem:[%s1291_s13 + $0x70] sm:$0xff]  ;;  %s338_s17 = scalar_lea.vmem %s1472_s4, %s1268_s15  ;;  %s1355_s27 = scalar_lea.vmem %s1471_s3, %s867_s19 }
  0x1b   : > { %912 = vmatprep.subr.mxu0 %v1163_v1  ;;  %920 = vmatpush3.xpose.msk.msra.mxu1 %vm344_vm1, %v433_v6  ;;  %v431_v8 = vld [vmem:[%s1291_s13 + $0x68] sm:$0xff]  ;;  %v430_v9 = vld [vmem:[%s1291_s13 + $0x60] sm:$0xff]  ;;  %v429_v10 = vld [vmem:[%s1291_s13 + $0x58] sm:$0xff]  ;;  %s1389_s15 = sand.u32 1, %s1145_s22  }
  0x1c   : > { %913 = vmatpush3.msra.mxu0 %v341_v3  ;;  %921 = vmatprep.subr.mxu1 %v1163_v1  ;;  %v428_v11 = vld [vmem:[%s1291_s13 + $0x50] sm:$0xff]  ;;  %v427_v12 = vld [vmem:[%s1291_s13 + $0x48] sm:$0xff]  ;;  %v426_v13 = vld [vmem:[%s1291_s13 + $0x40] sm:$0xff]  ;;  %s1476_s19 = sshll.u32 %s1389_s15, 3  ;;  %s665_s14 = scalar_lea.sflag [#allocation5], %s1389_s15 }
  0x1d   : > { %914 = vmatprep.subr.mxu0 %v1163_v1  ;;  %v425_v14 = vld [vmem:[%s1291_s13 + $0x38] sm:$0xff]  ;;  %v424_v15 = vld [vmem:[%s1291_s13 + $0x30] sm:$0xff]  ;;  %v423_v16 = vld [vmem:[%s1291_s13 + $0x28] sm:$0xff]  ;;  %s318_s28 = scalar_lea.vmem [#allocation4], %s1476_s19 }
  0x1e   : > { %915 = vmatpush3.msra.mxu0 %v340_v4  ;;  %v422_v17 = vld [vmem:[%s1291_s13 + $0x20] sm:$0xff]  ;;  %v421_v18 = vld [vmem:[%s1291_s13 + $0x18] sm:$0xff]  ;;  %v420_v19 = vld [vmem:[%s1291_s13 + $0x10] sm:$0xff] }
  0x1f   : > { %917 = vmatmul.mubr.msk.f32.vlgmr.msra.gmra.mxu0 %vm344_vm1, %v339_v5  ;;  %954 = vmatprep.subr.mxu0 %v1163_v1  ;;  %v419_v20 = vld [vmem:[%s1291_s13 + $0x8] sm:$0xff]  ;;  %v418_v21 = vld [vmem:[%s1291_s13] sm:$0xff]  ;;  %v586_v28 = vld [vmem:[%s1355_s27 + $0x78] sm:$0xff]  ;;  %s693_s13 = sshll.u32 %s318_s28, 4  ;;  %s694_s13 = int_to_ptr.vmem [resolvable:$true] %s693_s13 }
  0x20   : > { %986 = vmatprep.mubr.msk.f32.mxu0 %vm1164_vm0, %v1163_v1  ;;  %922 = vmatpush3.xpose.msk.msra.mxu1 %vm344_vm1, %v432_v7  ;;  %v843_v24 = vld [vmem:[%s338_s17] ss:$0 sm:$0xff]  ;;  %v585_v29 = vld [vmem:[%s1355_s27 + $0x70] sm:$0xff]  ;;  %v584_v30 = vld [vmem:[%s1355_s27 + $0x68] sm:$0xff]  ;;  %s1055_s16 = scalar_lea.vmem %s694_s13, 128  ;;  %s1165_s17 = smov [#allocation4]  }
  0x21   : > { %923 = vmatprep.subr.mxu1 %v1163_v1  ;;  %955 = vmatpush3.msra.mxu0 %v586_v28  ;;  %v583_v31 = vld [vmem:[%s1355_s27 + $0x60] sm:$0xff]  ;;  %v582_v32 = vld [vmem:[%s1355_s27 + $0x58] sm:$0xff]  ;;  %v581_v33 = vld [vmem:[%s1355_s27 + $0x50] sm:$0xff]  ;;  %p1056_p12 = scmp.ne.s32.totalorder %s694_s13, %s1055_s16  ;;  %s1059_s18 = sshll.u32 %s1165_s17, 4  ;;  %s1060_s18 = int_to_ptr.vmem [resolvable:$false] %s1059_s18 }
  0x22   : > { %956 = vmatprep.subr.mxu0 %v1163_v1  ;;  %v580_v34 = vld [vmem:[%s1355_s27 + $0x48] sm:$0xff]  ;;  %v579_v35 = vld [vmem:[%s1355_s27 + $0x40] sm:$0xff]  ;;  %v578_v40 = vld [vmem:[%s1355_s27 + $0x38] sm:$0xff]  ;;  %s1061_s20 = scalar_lea.vmem %s1060_s18, 256  ;;  %p1062_p1 = scmp.lt.s32.totalorder %s694_s13, %s1060_s18 }
  0x23   : > { %957 = vmatpush3.msra.mxu0 %v585_v29  ;;  %v577_v41 = vld [vmem:[%s1355_s27 + $0x30] sm:$0xff]  ;;  %v576_v42 = vld [vmem:[%s1355_s27 + $0x28] sm:$0xff]  ;;  %v575_v43 = vld [vmem:[%s1355_s27 + $0x20] sm:$0xff]  ;;  %p1057_p13 = pnand %p1056_p12, %p1242_p4  ;;  %p1063_p2 = scmp.lt.s32.totalorder %s1061_s20, %s1055_s16 }
  0x24   : > { %924 = vmatpush3.xpose.msk.msra.mxu1 %vm344_vm1, %v431_v8  ;;  %958 = vmatprep.subr.mxu0 %v1163_v1  ;;  %v574_v44 = vld [vmem:[%s1355_s27 + $0x18] sm:$0xff]  ;;  %v573_v45 = vld [vmem:[%s1355_s27 + $0x10] sm:$0xff]  ;;  %v572_v46 = vld [vmem:[%s1355_s27 + $0x8] sm:$0xff] }
  0x25   : > { %925 = vmatprep.subr.mxu1 %v1163_v1  ;;  %959 = vmatpush3.msra.mxu0 %v584_v30  ;;  %v571_v47 = vld [vmem:[%s1355_s27] sm:$0xff]  ;;  %p1058_p0 = pneg %p1057_p13  ;;  %p1064_p3 = por %p1063_p2, %p1062_p1 }
  0x26   : > { %960 = vmatprep.subr.mxu0 %v1163_v1 }
  0x27   : > { %961 = vmatpush3.msra.mxu0 %v583_v31  ;;  %p1065_p5 = pnand %p1064_p3, %p1058_p0 }
  0x28   : > { %926 = vmatpush3.xpose.msk.msra.mxu1 %vm344_vm1, %v430_v9  ;;  %962 = vmatprep.subr.mxu0 %v1163_v1 }
  0x29   : > { %927 = vmatprep.subr.mxu1 %v1163_v1  ;;  %963 = vmatpush3.msra.mxu0 %v582_v32 }
  0x2a   : > { %964 = vmatprep.subr.mxu0 %v1163_v1 }
  0x2b   : > { %965 = vmatpush3.msra.mxu0 %v581_v33 }
  0x2c   : > { %928 = vmatpush3.xpose.msk.msra.mxu1 %vm344_vm1, %v429_v10  ;;  %966 = vmatprep.subr.mxu0 %v1163_v1 }
  0x2d   : > { %929 = vmatprep.subr.mxu1 %v1163_v1  ;;  %967 = vmatpush3.msra.mxu0 %v580_v34 }
  0x2e   : > { %968 = vmatprep.subr.mxu0 %v1163_v1 }
  0x2f   : > { %969 = vmatpush3.msra.mxu0 %v579_v35 }
  0x30   : > { %930 = vmatpush3.xpose.msk.msra.mxu1 %vm344_vm1, %v428_v11  ;;  %970 = vmatprep.subr.mxu0 %v1163_v1 }
  0x31   : > { %931 = vmatprep.subr.mxu1 %v1163_v1  ;;  %971 = vmatpush3.msra.mxu0 %v578_v40 }
  0x32   : > { %972 = vmatprep.subr.mxu0 %v1163_v1 }
  0x33   : > { %973 = vmatpush3.msra.mxu0 %v577_v41 }
  0x34   : > { %932 = vmatpush3.xpose.msk.msra.mxu1 %vm344_vm1, %v427_v12  ;;  %974 = vmatprep.subr.mxu0 %v1163_v1 }
  0x35   : > { %933 = vmatprep.subr.mxu1 %v1163_v1  ;;  %975 = vmatpush3.msra.mxu0 %v576_v42 }
  0x36   : > { %976 = vmatprep.subr.mxu0 %v1163_v1 }
  0x37   : > { %977 = vmatpush3.msra.mxu0 %v575_v43 }
  0x38   : > { %934 = vmatpush3.xpose.msk.msra.mxu1 %vm344_vm1, %v426_v13  ;;  %978 = vmatprep.subr.mxu0 %v1163_v1 }
  0x39   : > { %935 = vmatprep.subr.mxu1 %v1163_v1  ;;  %979 = vmatpush3.msra.mxu0 %v574_v44 }
  0x3a   : > { %980 = vmatprep.subr.mxu0 %v1163_v1 }
  0x3b   : > { %981 = vmatpush3.msra.mxu0 %v573_v45 }
  0x3c   : > { %936 = vmatpush3.xpose.msk.msra.mxu1 %vm344_vm1, %v425_v14  ;;  %982 = vmatprep.subr.mxu0 %v1163_v1 }
  0x3d   : > { %937 = vmatprep.subr.mxu1 %v1163_v1  ;;  %983 = vmatpush3.msra.mxu0 %v572_v46 }
  0x3e   : > { %984 = vmatprep.subr.mxu0 %v1163_v1 }
  0x3f   : > { %985 = vmatpush3.msra.mxu0 %v571_v47 }
  0x40   : > { %938 = vmatpush3.xpose.msk.msra.mxu1 %vm344_vm1, %v424_v15 }
  0x41   : > { %939 = vmatprep.subr.mxu1 %v1163_v1 }
  0x44   : > { %940 = vmatpush3.xpose.msk.msra.mxu1 %vm344_vm1, %v423_v16 }
  0x45   : > { %941 = vmatprep.subr.mxu1 %v1163_v1 }
  0x48   : > { %942 = vmatpush3.xpose.msk.msra.mxu1 %vm344_vm1, %v422_v17 }
  0x49   : > { %943 = vmatprep.subr.mxu1 %v1163_v1 }
  0x4c   : > { %944 = vmatpush3.xpose.msk.msra.mxu1 %vm344_vm1, %v421_v18 }
  0x4d   : > { %945 = vmatprep.subr.mxu1 %v1163_v1 }
  0x50   : > { %946 = vmatpush3.xpose.msk.msra.mxu1 %vm344_vm1, %v420_v19 }
  0x51   : > { %947 = vmatprep.subr.mxu1 %v1163_v1 }
  0x54   : > { %948 = vmatpush3.xpose.msk.msra.mxu1 %vm344_vm1, %v419_v20 }
  0x55   : > { %949 = vmatprep.subr.mxu1 %v1163_v1 }
  0x58   : > { %950 = vmatpush3.xpose.msk.msra.mxu1 %vm344_vm1, %v418_v21 }
  0xdf   : > { %v414_v22 = vpop.f32.mrf.mxu0 }
  0xe0   : > { %952 = vmatmul.mubr.msk.f32.vlgmr.msra.gmra.mxu1 %vm344_vm1, %v414_v22 }
  0xe1   : > { %v918_v23 = vpop.f32.mrf.mxu0 }
 0x1a0   : > { %v558_v25 = vpop.f32.mrf.mxu1 }
 0x1a1   : > { %v559_v26 = vadd.f32 %v843_v24, %v558_v25 }
 0x1a2   : > { %v953_v27 = vpop.f32.mrf.mxu1 }
 0x1a3   : > { %562 = vmax.xlane.f32.xlu0 %v559_v26 }
 0x22c   : > { %v563_v36 = vpop.xlane.xlu0 %562 }
 0x22d   : > { %v564_v37 = vsub.f32 %v559_v26, %v563_v36 }
 0x22f   : > { %v565_v38 = vmul.f32 1.442695, %v564_v37 }
 0x231   : > { %1051 = vpow2.f32 %v565_v38 }
 0x23e   : > { %v1052_v39 = vpop.eup %1051 }
 0x23f   : > { %567 = vadd.xlane.f32.xlu0 %v1052_v39 }
 0x2c8   : > { %v568_v48 = vpop.xlane.xlu0 %567 }
 0x2c9   : > { %1053 = vrcp.f32 %v568_v48 }
 0x2d6   : > { %v1054_v49 = vpop.eup %1053 }
 0x2d7   : > { %v570_v50 = vmul.f32 %v1054_v49, %v1052_v39 }
 0x2d9   : > { %987 = vmatmul.mubr.f32.vlgmr.msra.gmra.mxu0 %v570_v50  ;;  %658 = vst [vmem:[%s318_s28] sm:$0xff] %v570_v50 }
 0x2da   : > { %1068 = shalt.err (!%p1065_p5)
}
 0x2db   : > { %s1069_s27 = scalar_lea.hbm %s691_s12, 128  ;;  %s1073_s11 = scalar_lea.hbm %s1474_s6, 256 }
 0x2dc   : > { %p1070_p6 = scmp.ne.s32.totalorder %s691_s12, %s1069_s27  ;;  %p1074_p10 = scmp.lt.s32.totalorder %s691_s12, %s1474_s6 }
 0x2dd   : > { %p1075_p11 = scmp.lt.s32.totalorder %s1073_s11, %s1069_s27 }
 0x2de   : > { %p1071_p7 = pnand %p1070_p6, %p1242_p4 }
 0x2df   : > { %p1076_p12 = por %p1075_p11, %p1074_p10 }
 0x2e0   : > { %p1072_p9 = pneg %p1071_p7 }
 0x2e2   : > { %p1077_p13 = pnand %p1076_p12, %p1072_p9 }
 0x2e4   : > { %1080 = shalt.err (!%p1077_p13)
}
 0x2e5   : > { %990 = dma.vmem_to_hbm [thread:$0]  (%p1242_p4), %s694_s13, 128, %s691_s12, %s665_s14  }
 0x2e6   : > { %s1479_s16 = sshll.u32 %s1389_s15, 3  ;;  %s1480_s20 = sshll.u32 %s1153_s24, 7 }
 0x2e7   : > { %s311_s17 = scalar_lea.vmem [#allocation2], %s1479_s16  ;;  %s1420_s19 = scalar_lea.hbm %s1473_s5, %s1480_s20 }
 0x2e8   : > { %s679_s18 = sshll.u32 %s311_s17, 4  ;;  %s660_s30 = scalar_lea.sflag [#allocation3], %s1389_s15  ;;  %s1422_s18 = int_to_ptr.vmem [resolvable:$true] %s679_s18 }
 0x2e9   : > { %s1081_s12 = scalar_lea.vmem %s1422_s18, 128  ;;  %s1166_s24 = smov [#allocation2]  }
 0x2ea   : > { %p1082_p0 = scmp.ne.s32.totalorder %s1422_s18, %s1081_s12  ;;  %s1085_s13 = sshll.u32 %s1166_s24, 4  ;;  %s1086_s13 = int_to_ptr.vmem [resolvable:$false] %s1085_s13 }
 0x2eb   : > { %s1087_s14 = scalar_lea.vmem %s1086_s13, 256  ;;  %p1088_p3 = scmp.lt.s32.totalorder %s1422_s18, %s1086_s13 }
 0x2ec   : > { %p1083_p1 = pnand %p1082_p0, %p1242_p4  ;;  %p1089_p5 = scmp.lt.s32.totalorder %s1087_s14, %s1081_s12 }
 0x2ee   : > { %p1084_p2 = pneg %p1083_p1  ;;  %p1090_p6 = por %p1089_p5, %p1088_p3 }
 0x2f0   : > { %p1091_p7 = pnand %p1090_p6, %p1084_p2 }
 0x399   : > { %v653_v51 = vpop.f32.mrf.mxu0 }
 0x39a   : > { %657 = vst.msk [vmem:[%s311_s17] sm:$0xff] %vm344_vm1, %v653_v51 }
 0x39b   : > { %v988_v52 = vpop.f32.mrf.mxu0 }
 0x39c   : > { %1094 = shalt.err (!%p1091_p7)
}
 0x39d   : > { %s1095_s27 = scalar_lea.hbm %s1420_s19, 128  ;;  %s1099_s16 = scalar_lea.hbm %s1473_s5, 256 }
 0x39e   : > { %p1096_p9 = scmp.ne.s32.totalorder %s1420_s19, %s1095_s27  ;;  %p1100_p12 = scmp.lt.s32.totalorder %s1420_s19, %s1473_s5 }
 0x39f   : > { %p1101_p13 = scmp.lt.s32.totalorder %s1099_s16, %s1095_s27 }
 0x3a0   : > { %p1097_p10 = pnand %p1096_p9, %p1242_p4 }
 0x3a1   : > { %p1102_p0 = por %p1101_p13, %p1100_p12 }
 0x3a2   : > { %p1098_p11 = pneg %p1097_p10 }
 0x3a4   : > { %p1103_p1 = pnand %p1102_p0, %p1098_p11 }
 0x3a6   : > { %1106 = shalt.err (!%p1103_p1)
}
 0x3a7   : > { %989 = dma.vmem_to_hbm [thread:$0]  (%p1242_p4), %s1422_s18, 128, %s1420_s19, %s660_s30  }
 0x3a8 PF: > { %p1000_p2 = scmp.ge.s32.totalorder %s1161_s26, 2  ;;  %s705_s28 = sand.u32 1, %s1141_s21  }
 0x3a9   : > { %s706_s8 = scalar_lea.sflag [#allocation3], %s705_s28 }
 0x3aa   : > { %p994_p3 = pnand %p1000_p2, %p1249_p8 }
 0x3ac   : > { %p995_p5 = pneg %p994_p3 }
 0x3ae   : > { %1132 = dma.done.wait (%p995_p5), %s706_s8, 128  }
 0x3af   : > { %1134 = vsyncadd (%p995_p5), %s706_s8, 4294967168  ;;  %s715_s12 = scalar_lea.sflag [#allocation5], %s705_s28 }
 0x3b0   : > { %1136 = dma.done.wait (%p995_p5), %s715_s12, 128  }
 0x3b1   : > { %1138 = vsyncadd (%p995_p5), %s715_s12, 4294967168  ;;  %s23_s26 = sadd.s32 1, %s1161_s26   ;;  %s1481_s21 = smov %s1145_s22 }
 0x3b2   : > { %p20_p6 = scmp.ge.s32.totalorder %s23_s26, 4   ;;  %s1482_s22 = smov %s1149_s23 }
 0x3b3   : > { %s1483_s23 = smov %s1255_s10  ;;  %s1484_s24 = smov %s1157_s25 }
 0x3b4   : > { %s1485_s25 = smov %s1487_s29  ;;  %22 = sbr.rel (!%p20_p6) target bundleno = 6 (0x6), region = 101 }
 0x3b9   :  { %720 = vsyncpa [#allocation3], 1 }
 0x3ba   :  { %722 = vsyncpa [#allocation3 + $0x1], 1 }
 0x3bb   :  { %723 = vsyncpa [#allocation5], 1 }
 0x3bc   :  { %725 = vsyncpa [#allocation5 + $0x1], 1 }

</bundles_post_ra>
